<compile_context>
chip_gen: v7x
topology: tpu7x:2x2x1
jax: 0.10.0
libtpu: 0.0.40
codegen_flags: <defaults>
</compile_context>

<pallas_src>
import jax
import jax.numpy as jnp
from jax.experimental import pallas as pl
from jax.experimental.pallas import tpu as pltpu


def curvenet_kernel(x_ref, w1_ref, w2_ref, w3_ref, w4t_ref, b_ref, o_ref):
    # x_ref: (TILE_B, 4) f32; w1: (4,64) f32; w2/w3: (64,64) bf16;
    # w4t: (4,64) f32 (row c = column c of W4); b_ref: (4,64) f32 bias slab.
    x = x_ref[...]
    w1 = w1_ref[...]
    b = b_ref[...]

    # ---- Layer 1 (K=4): off the MXU -> 4 VPU broadcast-FMAs over (TILE_B, 64).
    h = (x[:, 0:1] * w1[0:1, :]
         + x[:, 1:2] * w1[1:2, :]
         + x[:, 2:3] * w1[2:3, :]
         + x[:, 3:4] * w1[3:4, :]) + b[0:1, :]
    h = jnp.maximum(h, 0.0).astype(jnp.bfloat16)

    # ---- Layers 2, 3 (64x64): MXU, bf16 operands, f32 accumulation.
    h = jnp.dot(h, w2_ref[...], preferred_element_type=jnp.float32) + b[1:2, :]
    h = jnp.maximum(h, 0.0).astype(jnp.bfloat16)

    h = jnp.dot(h, w3_ref[...], preferred_element_type=jnp.float32) + b[2:3, :]
    h = jnp.maximum(h, 0.0)  # stays f32 for the VPU/XLU final layer

    # ---- Layer 4 (N=4): off the MXU -> 4 elementwise muls + lane reductions.
    w4t = w4t_ref[...]
    cols = [jnp.sum(h * w4t[c:c + 1, :], axis=-1, keepdims=True)
            for c in range(4)]
    out = jnp.concatenate(cols, axis=-1) + b[3:4, 0:4]
    o_ref[...] = out.astype(o_ref.dtype)


def prepare_params(params):
    """One-time parameter prep (hoisted out of the per-call path)."""
    b4 = params["b4"]
    bias = jnp.concatenate(
        [params["b1"], params["b2"], params["b3"],
         jnp.pad(b4, ((0, 0), (0, 64 - b4.shape[1])))], axis=0)  # (4, 64)
    return {
        "w1": params["w1"].astype(jnp.float32),    # (4, 64)  VPU layer
        "w2": params["w2"].astype(jnp.bfloat16),   # (64, 64) MXU layer
        "w3": params["w3"].astype(jnp.bfloat16),   # (64, 64) MXU layer
        "w4t": params["w4"].T.astype(jnp.float32),  # (4, 64)  VPU/XLU layer
        "bias": bias.astype(jnp.float32),           # (4, 64)
    }


def curvenet_forward(x, prepped, tile_b=4096):
    """x: (B, 4) float32. prepped: output of prepare_params()."""
    B = x.shape[0]
    x = x.astype(jnp.float32)

    # Pick a batch tile: multiple of 8 (sublane), no larger than needed.
    if B <= tile_b:
        tile_b = max(8, ((B + 7) // 8) * 8)
        n_tiles = 1
    else:
        tile_b = max(8, (tile_b // 8) * 8)
        n_tiles = pl.cdiv(B, tile_b)
    B_pad = n_tiles * tile_b
    if B_pad != B:
        x = jnp.pad(x, ((0, B_pad - B), (0, 0)))

    flops = 2 * B_pad * (4 * 64 + 64 * 64 + 64 * 64 + 64 * 4)
    bytes_accessed = (B_pad * 4 * 4            # x (f32 in)
                      + B_pad * 4 * 4          # out (f32)
                      + 2 * 64 * 64 * 2        # w2, w3 (bf16)
                      + 3 * 4 * 64 * 4)        # w1, w4t, bias slab (f32)

    out = pl.pallas_call(
        curvenet_kernel,
        out_shape=jax.ShapeDtypeStruct((B_pad, 4), jnp.float32),
        grid=(n_tiles,),
        in_specs=[
            pl.BlockSpec((tile_b, 4), lambda i: (i, 0)),   # x: tiled over batch
            pl.BlockSpec((4, 64), lambda i: (0, 0)),       # w1: resident
            pl.BlockSpec((64, 64), lambda i: (0, 0)),      # w2: resident
            pl.BlockSpec((64, 64), lambda i: (0, 0)),      # w3: resident
            pl.BlockSpec((4, 64), lambda i: (0, 0)),       # w4^T: resident
            pl.BlockSpec((4, 64), lambda i: (0, 0)),       # bias slab: resident
        ],
        out_specs=pl.BlockSpec((tile_b, 4), lambda i: (i, 0)),
        compiler_params=pltpu.CompilerParams(
            dimension_semantics=("parallel",)),
        cost_estimate=pl.CostEstimate(
            flops=flops, transcendentals=0, bytes_accessed=bytes_accessed),
    )(x, prepped["w1"], prepped["w2"], prepped["w3"],
      prepped["w4t"], prepped["bias"])

    return out[:B]


def init_params(key):
    """Synthetic parameters matching CurveNet's layer shapes.

    PyTorch nn.Linear(in, out) holds weight (out, in) and bias (out,); here
    weights are stored pre-transposed as (in, out), biases as (1, out).
    """
    dims = [(4, 64), (64, 64), (64, 64), (64, 4)]
    params = {}
    for i, (din, dout) in enumerate(dims, start=1):
        key, kw, kb = jax.random.split(key, 3)
        bound = 1.0 / jnp.sqrt(jnp.float32(din))
        params[f"w{i}"] = jax.random.uniform(
            kw, (din, dout), jnp.float32, minval=-bound, maxval=bound)
        params[f"b{i}"] = jax.random.uniform(
            kb, (1, dout), jnp.float32, minval=-bound, maxval=bound)
    return params


def reference_forward_mixed(x, params):
    """Mirrors the kernel's math: f32 layers 1 & 4, bf16-operand MXU layers 2 & 3."""
    h = jnp.maximum(x @ params["w1"] + params["b1"], 0.0)
    h = jnp.maximum(
        jnp.dot(h.astype(jnp.bfloat16), params["w2"].astype(jnp.bfloat16),
                preferred_element_type=jnp.float32) + params["b2"], 0.0)
    h = jnp.maximum(
        jnp.dot(h.astype(jnp.bfloat16), params["w3"].astype(jnp.bfloat16),
                preferred_element_type=jnp.float32) + params["b3"], 0.0)
    return h @ params["w4"] + params["b4"]


def reference_forward_f32(x, params):
    h = jnp.maximum(x @ params["w1"] + params["b1"], 0.0)
    h = jnp.maximum(h @ params["w2"] + params["b2"], 0.0)
    h = jnp.maximum(h @ params["w3"] + params["b3"], 0.0)
    return h @ params["w4"] + params["b4"]


if __name__ == "__main__":
    key = jax.random.PRNGKey(0)
    kx, kx2, kp = jax.random.split(key, 3)

    params = init_params(kp)
    prepped = prepare_params(params)

    # --- Small single-tile run ---
    batch = 8
    x = jax.random.normal(kx, (batch, 4), dtype=jnp.float32)
    out = jax.block_until_ready(curvenet_forward(x, prepped))
    assert out.shape == (batch, 4)

    ref_mixed = reference_forward_mixed(x, params)
    assert jnp.allclose(out, ref_mixed, atol=2e-3, rtol=2e-3), (
        float(jnp.max(jnp.abs(out - ref_mixed))))
    ref_f32 = reference_forward_f32(x, params)
    assert jnp.allclose(out, ref_f32, atol=5e-2, rtol=5e-2), (
        float(jnp.max(jnp.abs(out - ref_f32))))

    # --- Multi-tile / padded-tail path (tiny tile to exercise the grid) ---
    batch2 = 40
    x2 = jax.random.normal(kx2, (batch2, 4), dtype=jnp.float32)
    out2 = jax.block_until_ready(curvenet_forward(x2, prepped, tile_b=16))
    assert out2.shape == (batch2, 4)
    ref2 = reference_forward_mixed(x2, params)
    assert jnp.allclose(out2, ref2, atol=2e-3, rtol=2e-3), (
        float(jnp.max(jnp.abs(out2 - ref2))))

    print("KERNEL_OK")
</pallas_src>

<mosaic_0001>
module attributes {stable_mosaic.version = 11 : i64} {
  func.func @curvenet_kernel(%arg0: i32, %arg1: memref<8x4xf32, #tpu.memory_space<vmem>>, %arg2: memref<4x64xf32, #tpu.memory_space<vmem>>, %arg3: memref<64x64xbf16, #tpu.memory_space<vmem>>, %arg4: memref<64x64xbf16, #tpu.memory_space<vmem>>, %arg5: memref<4x64xf32, #tpu.memory_space<vmem>>, %arg6: memref<4x64xf32, #tpu.memory_space<vmem>>, %arg7: memref<8x4xf32, #tpu.memory_space<vmem>>) attributes {dimension_semantics = [#tpu.dimension_semantics<parallel>], iteration_bounds = array<i64: 1>, scalar_prefetch = 0 : i64, scratch_operands = 0 : i64, tpu.core_type = #tpu.core_type<tc>, window_params = [{transform_indices = @transform_0, window_bounds = array<i64: 8, 4>}, {pipeline_mode = #tpu.pipeline_mode<synchronous>, transform_indices = @transform_1, window_bounds = array<i64: 4, 64>}, {pipeline_mode = #tpu.pipeline_mode<synchronous>, transform_indices = @transform_2, window_bounds = array<i64: 64, 64>}, {pipeline_mode = #tpu.pipeline_mode<synchronous>, transform_indices = @transform_3, window_bounds = array<i64: 64, 64>}, {pipeline_mode = #tpu.pipeline_mode<synchronous>, transform_indices = @transform_4, window_bounds = array<i64: 4, 64>}, {pipeline_mode = #tpu.pipeline_mode<synchronous>, transform_indices = @transform_5, window_bounds = array<i64: 4, 64>}, {transform_indices = @transform_6, window_bounds = array<i64: 8, 4>}]} {
    %c0 = arith.constant 0 : index
    %c0_0 = arith.constant 0 : index
    %0 = vector.load %arg1[%c0, %c0_0] : memref<8x4xf32, #tpu.memory_space<vmem>>, vector<8x4xf32>
    %c0_1 = arith.constant 0 : index
    %c0_2 = arith.constant 0 : index
    %1 = vector.load %arg2[%c0_1, %c0_2] : memref<4x64xf32, #tpu.memory_space<vmem>>, vector<4x64xf32>
    %c0_3 = arith.constant 0 : index
    %c0_4 = arith.constant 0 : index
    %2 = vector.load %arg6[%c0_3, %c0_4] : memref<4x64xf32, #tpu.memory_space<vmem>>, vector<4x64xf32>
    %3 = vector.extract_strided_slice %0 {offsets = [0, 0], sizes = [8, 1], strides = [1, 1]} : vector<8x4xf32> to vector<8x1xf32>
    %4 = vector.extract_strided_slice %1 {offsets = [0, 0], sizes = [1, 64], strides = [1, 1]} : vector<4x64xf32> to vector<1x64xf32>
    %5 = vector.broadcast %3 : vector<8x1xf32> to vector<8x64xf32>
    %6 = vector.broadcast %4 : vector<1x64xf32> to vector<8x64xf32>
    %7 = arith.mulf %5, %6 : vector<8x64xf32>
    %8 = vector.extract_strided_slice %0 {offsets = [0, 1], sizes = [8, 1], strides = [1, 1]} : vector<8x4xf32> to vector<8x1xf32>
    %9 = vector.extract_strided_slice %1 {offsets = [1, 0], sizes = [1, 64], strides = [1, 1]} : vector<4x64xf32> to vector<1x64xf32>
    %10 = vector.broadcast %8 : vector<8x1xf32> to vector<8x64xf32>
    %11 = vector.broadcast %9 : vector<1x64xf32> to vector<8x64xf32>
    %12 = arith.mulf %10, %11 : vector<8x64xf32>
    %13 = arith.addf %7, %12 : vector<8x64xf32>
    %14 = vector.extract_strided_slice %0 {offsets = [0, 2], sizes = [8, 1], strides = [1, 1]} : vector<8x4xf32> to vector<8x1xf32>
    %15 = vector.extract_strided_slice %1 {offsets = [2, 0], sizes = [1, 64], strides = [1, 1]} : vector<4x64xf32> to vector<1x64xf32>
    %16 = vector.broadcast %14 : vector<8x1xf32> to vector<8x64xf32>
    %17 = vector.broadcast %15 : vector<1x64xf32> to vector<8x64xf32>
    %18 = arith.mulf %16, %17 : vector<8x64xf32>
    %19 = arith.addf %13, %18 : vector<8x64xf32>
    %20 = vector.extract_strided_slice %0 {offsets = [0, 3], sizes = [8, 1], strides = [1, 1]} : vector<8x4xf32> to vector<8x1xf32>
    %21 = vector.extract_strided_slice %1 {offsets = [3, 0], sizes = [1, 64], strides = [1, 1]} : vector<4x64xf32> to vector<1x64xf32>
    %22 = vector.broadcast %20 : vector<8x1xf32> to vector<8x64xf32>
    %23 = vector.broadcast %21 : vector<1x64xf32> to vector<8x64xf32>
    %24 = arith.mulf %22, %23 : vector<8x64xf32>
    %25 = arith.addf %19, %24 : vector<8x64xf32>
    %26 = vector.extract_strided_slice %2 {offsets = [0, 0], sizes = [1, 64], strides = [1, 1]} : vector<4x64xf32> to vector<1x64xf32>
    %27 = vector.broadcast %26 : vector<1x64xf32> to vector<8x64xf32>
    %28 = arith.addf %25, %27 : vector<8x64xf32>
    %cst = arith.constant 0.000000e+00 : f32
    %29 = vector.broadcast %cst : f32 to vector<8x64xf32>
    %30 = arith.maximumf %28, %29 : vector<8x64xf32>
    %31 = arith.truncf %30 : vector<8x64xf32> to vector<8x64xbf16>
    %c0_5 = arith.constant 0 : index
    %c0_6 = arith.constant 0 : index
    %32 = vector.load %arg3[%c0_5, %c0_6] : memref<64x64xbf16, #tpu.memory_space<vmem>>, vector<64x64xbf16>
    %cst_7 = arith.constant dense<0.000000e+00> : vector<8x64xf32>
    %33 = tpu.matmul %31, %32, %cst_7 {dimension_numbers = #tpu.dot_dimension_numbers<[1], [0], [0], [1], [0, 0, 1, 1], [], []>} : vector<8x64xbf16>, vector<64x64xbf16>, vector<8x64xf32> -> vector<8x64xf32>
    %34 = vector.extract_strided_slice %2 {offsets = [1, 0], sizes = [1, 64], strides = [1, 1]} : vector<4x64xf32> to vector<1x64xf32>
    %35 = vector.broadcast %34 : vector<1x64xf32> to vector<8x64xf32>
    %36 = arith.addf %33, %35 : vector<8x64xf32>
    %cst_8 = arith.constant 0.000000e+00 : f32
    %37 = vector.broadcast %cst_8 : f32 to vector<8x64xf32>
    %38 = arith.maximumf %36, %37 : vector<8x64xf32>
    %39 = arith.truncf %38 : vector<8x64xf32> to vector<8x64xbf16>
    %c0_9 = arith.constant 0 : index
    %c0_10 = arith.constant 0 : index
    %40 = vector.load %arg4[%c0_9, %c0_10] : memref<64x64xbf16, #tpu.memory_space<vmem>>, vector<64x64xbf16>
    %cst_11 = arith.constant dense<0.000000e+00> : vector<8x64xf32>
    %41 = tpu.matmul %39, %40, %cst_11 {dimension_numbers = #tpu.dot_dimension_numbers<[1], [0], [0], [1], [0, 0, 1, 1], [], []>} : vector<8x64xbf16>, vector<64x64xbf16>, vector<8x64xf32> -> vector<8x64xf32>
    %42 = vector.extract_strided_slice %2 {offsets = [2, 0], sizes = [1, 64], strides = [1, 1]} : vector<4x64xf32> to vector<1x64xf32>
    %43 = vector.broadcast %42 : vector<1x64xf32> to vector<8x64xf32>
    %44 = arith.addf %41, %43 : vector<8x64xf32>
    %cst_12 = arith.constant 0.000000e+00 : f32
    %45 = vector.broadcast %cst_12 : f32 to vector<8x64xf32>
    %46 = arith.maximumf %44, %45 : vector<8x64xf32>
    %c0_13 = arith.constant 0 : index
    %c0_14 = arith.constant 0 : index
    %47 = vector.load %arg5[%c0_13, %c0_14] : memref<4x64xf32, #tpu.memory_space<vmem>>, vector<4x64xf32>
    %48 = vector.extract_strided_slice %47 {offsets = [0, 0], sizes = [1, 64], strides = [1, 1]} : vector<4x64xf32> to vector<1x64xf32>
    %49 = vector.broadcast %48 : vector<1x64xf32> to vector<8x64xf32>
    %50 = arith.mulf %46, %49 : vector<8x64xf32>
    %cst_15 = arith.constant dense<0.000000e+00> : vector<8xf32>
    %51 = vector.multi_reduction <add>, %50, %cst_15 [1] : vector<8x64xf32> to vector<8xf32>
    %52 = vector.shape_cast %51 : vector<8xf32> to vector<8x1xf32>
    %53 = vector.extract_strided_slice %47 {offsets = [1, 0], sizes = [1, 64], strides = [1, 1]} : vector<4x64xf32> to vector<1x64xf32>
    %54 = vector.broadcast %53 : vector<1x64xf32> to vector<8x64xf32>
    %55 = arith.mulf %46, %54 : vector<8x64xf32>
    %cst_16 = arith.constant dense<0.000000e+00> : vector<8xf32>
    %56 = vector.multi_reduction <add>, %55, %cst_16 [1] : vector<8x64xf32> to vector<8xf32>
    %57 = vector.shape_cast %56 : vector<8xf32> to vector<8x1xf32>
    %58 = vector.extract_strided_slice %47 {offsets = [2, 0], sizes = [1, 64], strides = [1, 1]} : vector<4x64xf32> to vector<1x64xf32>
    %59 = vector.broadcast %58 : vector<1x64xf32> to vector<8x64xf32>
    %60 = arith.mulf %46, %59 : vector<8x64xf32>
    %cst_17 = arith.constant dense<0.000000e+00> : vector<8xf32>
    %61 = vector.multi_reduction <add>, %60, %cst_17 [1] : vector<8x64xf32> to vector<8xf32>
    %62 = vector.shape_cast %61 : vector<8xf32> to vector<8x1xf32>
    %63 = vector.extract_strided_slice %47 {offsets = [3, 0], sizes = [1, 64], strides = [1, 1]} : vector<4x64xf32> to vector<1x64xf32>
    %64 = vector.broadcast %63 : vector<1x64xf32> to vector<8x64xf32>
    %65 = arith.mulf %46, %64 : vector<8x64xf32>
    %cst_18 = arith.constant dense<0.000000e+00> : vector<8xf32>
    %66 = vector.multi_reduction <add>, %65, %cst_18 [1] : vector<8x64xf32> to vector<8xf32>
    %67 = vector.shape_cast %66 : vector<8xf32> to vector<8x1xf32>
    %68 = tpu.concatenate %52, %57, %62, %67 in 1 : vector<8x1xf32>, vector<8x1xf32>, vector<8x1xf32>, vector<8x1xf32> -> vector<8x4xf32>
    %69 = vector.extract_strided_slice %2 {offsets = [3, 0], sizes = [1, 4], strides = [1, 1]} : vector<4x64xf32> to vector<1x4xf32>
    %70 = vector.broadcast %69 : vector<1x4xf32> to vector<8x4xf32>
    %71 = arith.addf %68, %70 : vector<8x4xf32>
    %c0_19 = arith.constant 0 : index
    %c0_20 = arith.constant 0 : index
    %72 = vector.load %arg7[%c0_19, %c0_20] : memref<8x4xf32, #tpu.memory_space<vmem>>, vector<8x4xf32>
    tpu.vector_store %arg7[%c0_19, %c0_20], %71 {strides = array<i32>} : memref<8x4xf32, #tpu.memory_space<vmem>>, vector<8x4xf32>,
    return
  }
  func.func @transform_0(%arg0: i32) -> (i32, i32) {
    %c0_i32 = arith.constant 0 : i32
    %c0_i32_0 = arith.constant 0 : i32
    return %arg0, %c0_i32 : i32, i32
  }
  func.func @transform_1(%arg0: i32) -> (i32, i32) {
    %c0_i32 = arith.constant 0 : i32
    %c0_i32_0 = arith.constant 0 : i32
    %c0_i32_1 = arith.constant 0 : i32
    return %c0_i32, %c0_i32_0 : i32, i32
  }
  func.func @transform_2(%arg0: i32) -> (i32, i32) {
    %c0_i32 = arith.constant 0 : i32
    %c0_i32_0 = arith.constant 0 : i32
    %c0_i32_1 = arith.constant 0 : i32
    return %c0_i32, %c0_i32_0 : i32, i32
  }
  func.func @transform_3(%arg0: i32) -> (i32, i32) {
    %c0_i32 = arith.constant 0 : i32
    %c0_i32_0 = arith.constant 0 : i32
    %c0_i32_1 = arith.constant 0 : i32
    return %c0_i32, %c0_i32_0 : i32, i32
  }
  func.func @transform_4(%arg0: i32) -> (i32, i32) {
    %c0_i32 = arith.constant 0 : i32
    %c0_i32_0 = arith.constant 0 : i32
    %c0_i32_1 = arith.constant 0 : i32
    return %c0_i32, %c0_i32_0 : i32, i32
  }
  func.func @transform_5(%arg0: i32) -> (i32, i32) {
    %c0_i32 = arith.constant 0 : i32
    %c0_i32_0 = arith.constant 0 : i32
    %c0_i32_1 = arith.constant 0 : i32
    return %c0_i32, %c0_i32_0 : i32, i32
  }
  func.func @transform_6(%arg0: i32) -> (i32, i32) {
    %c0_i32 = arith.constant 0 : i32
    %c0_i32_0 = arith.constant 0 : i32
    return %arg0, %c0_i32 : i32, i32
  }
}

</mosaic_0001>

<bundles_post_ra>
// kernel: tpu_custom_call.1
= control target key start
LH: loop header
LB: loop body
LE: loop exit
PB: predicated region body
PF: predicated region fallthrough
CT: control target
= control target key end

     0   :  { %11 = vsyncpa [#allocation3], 0  ;;  %s532_s0 = inlined_call_operand.vmem [shape: f32[8,4], index: 0, kind: input, shape index: {}]   ;;  %s533_s1 = inlined_call_operand.vmem [shape: f32[4,64], index: 1, kind: input, shape index: {}]   ;;  %s534_s2 = inlined_call_operand.hbm [shape: bf16[64,64], index: 2, kind: input, shape index: {}]   ;;  %s535_s3 = inlined_call_operand.hbm [shape: bf16[64,64], index: 3, kind: input, shape index: {}]   ;;  %s536_s4 = inlined_call_operand.vmem [shape: f32[4,64], index: 4, kind: input, shape index: {}]   ;;  %s537_s5 = inlined_call_operand.vmem [shape: f32[4,64], index: 5, kind: input, shape index: {}]   ;;  %s538_s6 = inlined_call_operand.vmem [shape: f32[8,4], index: 6, kind: output, shape index: {}]  }
   0x1   :  { %12 = vsyncpa [#allocation5], 0  ;;  %s431_s21 = smov [#allocation2]   ;;  %s383_s25 = scalar_lea.hbm %s534_s2, 512 }
   0x2   :  { %s22_s22 = sshll.u32 %s431_s21, 4  ;;  %p384_p0 = scmp.ne.s32.totalorder %s534_s2, %s383_s25  ;;  %s23_s22 = int_to_ptr.vmem [resolvable:$true] %s22_s22 }
   0x3   :  { %p387_p1 = scmp.lt.u32.totalorder %s383_s25, %s534_s2 }
   0x5   :  { %p389_p2 = pnand %p387_p1, %p384_p0 }
   0x7   :  { %392 = shalt.err (!%p389_p2)
}
   0x8   :  { %s393_s30 = scalar_lea.vmem %s23_s22, 512  ;;  %p398_p4 = scmp.lt.s32.totalorder %s23_s22, %s23_s22 }
   0x9   :  { %p394_p3 = scmp.ne.s32.totalorder %s23_s22, %s393_s30  ;;  %p399_p5 = scmp.lt.s32.totalorder %s393_s30, %s393_s30 }
   0xb   :  { %p400_p6 = por %p399_p5, %p398_p4 }
   0xd   :  { %p401_p7 = pnand %p400_p6, %p394_p3 }
   0xf   :  { %404 = shalt.err (!%p401_p7)
}
  0x10   :  { %s432_s7 = smov 64   ;;  %s433_s8 = smov 4  }
  0x11   :  { %28 = dma.hbm_to_vmem [thread:$0]  %s534_s2, 512, %s23_s22, [#allocation3], %s432_s7, %s432_s7, %s433_s8  }
  0x12   :  { %s434_s11 = smov [#allocation4]   ;;  %s405_s15 = scalar_lea.hbm %s535_s3, 512 }
  0x13   :  { %s34_s12 = sshll.u32 %s434_s11, 4  ;;  %p406_p8 = scmp.ne.s32.totalorder %s535_s3, %s405_s15  ;;  %s35_s12 = int_to_ptr.vmem [resolvable:$true] %s34_s12 }
  0x14   :  { %p409_p9 = scmp.lt.u32.totalorder %s405_s15, %s535_s3 }
  0x16   :  { %p411_p10 = pnand %p409_p9, %p406_p8 }
  0x18   :  { %414 = shalt.err (!%p411_p10)
}
  0x19   :  { %s415_s20 = scalar_lea.vmem %s35_s12, 512  ;;  %p420_p12 = scmp.lt.s32.totalorder %s35_s12, %s35_s12 }
  0x1a   :  { %p416_p11 = scmp.ne.s32.totalorder %s35_s12, %s415_s20  ;;  %p421_p13 = scmp.lt.s32.totalorder %s415_s20, %s415_s20 }
  0x1c   :  { %p422_p0 = por %p421_p13, %p420_p12 }
  0x1e   :  { %p423_p1 = pnand %p422_p0, %p416_p11 }
  0x20   :  { %426 = shalt.err (!%p423_p1)
}
  0x21   :  { %40 = dma.hbm_to_vmem [thread:$0]  %s535_s3, 512, %s35_s12, [#allocation5], %s432_s7, %s432_s7, %s433_s8  }
  0x22   :  { %427 = dma.done.wait [#allocation3], 512  }
  0x23   :  { %428 = vsyncadd [#allocation3], 4294966784 }
  0x24   :  { %429 = dma.done.wait [#allocation5], 512  }
  0x25   :  { %430 = vsyncadd [#allocation5], 4294966784  ;;  %v435_v0 = vmov 0   ;;  %v436_v1 = vmov 2   ;;  %v52_v2 = vld [vmem:[%s532_s0] sm:$0xff]  ;;  %v437_v4 = vmov 0.0   ;;  %v60_v12 = vlaneseq }
  0x26   :  { %370 = vset.pattern.permute.xlu0 %v435_v0  ;;  %372 = vset.pattern.permute.xlu1 %v436_v1  ;;  %v375_v3 = vld [vmem:[#allocation2] sm:$0xff]   ;;  %v438_v5 = vmov 1   ;;  %v439_v6 = vmov 3   ;;  %v376_v7 = vld [vmem:[#allocation2 + $0x8] sm:$0xff]   ;;  %v377_v8 = vld [vmem:[#allocation2 + $0x10] sm:$0xff]   ;;  %vm440_vm0 = vmmov 0  }
  0x27   :  { %57 = vperm.xlu0 %370, %v52_v2   ;;  %76 = vperm.xlu1 %372, %v52_v2   ;;  %v378_v9 = vld [vmem:[#allocation2 + $0x18] sm:$0xff]   ;;  %v379_v10 = vld [vmem:[#allocation4] sm:$0xff]   ;;  %v380_v11 = vld [vmem:[#allocation4 + $0x8] sm:$0xff]   ;;  %v61_v13 = vshrl.u32 %v60_v12, 7  ;;  %vm138_vm1 = vcmask 523264   ;;  %vm297_vm2 = vcmask 7168  }
  0x28   :  { %336 = vmatprep.subr.bf16.mxu0 %v437_v4  ;;  %348 = vmatprep.subr.bf16.mxu1 %v437_v4  ;;  %v53_v16 = vld [vmem:[%s533_s1] sm:$0xf]  ;;  %v381_v39 = vld [vmem:[#allocation4 + $0x10] sm:$0xff]   ;;  %v382_v40 = vld [vmem:[#allocation4 + $0x18] sm:$0xff]   ;;  %vm299_vm3 = vcmask 15360   ;;  %vm301_vm4 = vcmask 23552  }
  0x29   :  { %337 = vmatpush3.bf16.msra.mxu0 %v375_v3  ;;  %344 = vmatprep.mubr.msk.bf16.mxu0 %vm440_vm0, %v437_v4  ;;  %v62_v14 = vsub.s32 0, %v61_v13  ;;  %v71_v15 = vsub.s32 1, %v61_v13  ;;  %v81_v18 = vsub.s32 2, %v61_v13  ;;  %v506_v20 = vsub.s32 3, %v61_v13  ;;  %v512_v29 = vld [vmem:[%s537_s5] sm:$0xf] }
  0x2a   :  { %338 = vmatprep.subr.bf16.mxu0 %v437_v4  ;;  %356 = vmatprep.mubr.msk.bf16.mxu1 %vm440_vm0, %v437_v4  ;;  %v264_v50 = vld [vmem:[%s536_s4] sm:$0xf]  ;;  %vm308_vm5 = vcmask 31744  }
  0x2b   :  { %371 = vset.pattern.permute.xlu0 %v438_v5  ;;  %373 = vset.pattern.permute.xlu1 %v439_v6  ;;  %v63_v21 = vrot.slane %v53_v16, %v62_v14  ;;  %v72_v22 = vrot.slane %v53_v16, %v71_v15  ;;  %v82_v23 = vrot.slane %v53_v16, %v81_v18 }
  0x2c   :  { %66 = vperm.xlu0 %371, %v52_v2   ;;  %86 = vperm.xlu1 %373, %v52_v2   ;;  %v92_v24 = vrot.slane %v53_v16, %v506_v20  ;;  %v98_v33 = vrot.slane %v512_v29, %v62_v14  ;;  %v113_v41 = vrot.slane %v512_v29, %v71_v15 }
  0x2d   :  { %339 = vmatpush3.bf16.msra.mxu0 %v376_v7  ;;  %349 = vmatpush3.bf16.msra.mxu1 %v379_v10  ;;  %v195_v49 = vrot.slane %v512_v29, %v81_v18  ;;  %v276_v54 = vrot.slane %v264_v50, %v71_v15  ;;  %v268_v55 = vrot.slane %v264_v50, %v62_v14 }
  0x2e   :  { %340 = vmatprep.subr.bf16.mxu0 %v437_v4  ;;  %350 = vmatprep.subr.bf16.mxu1 %v437_v4  ;;  %v284_v59 = vrot.slane %v264_v50, %v81_v18  ;;  %v292_v60 = vrot.slane %v264_v50, %v506_v20  ;;  %v306_v7 = vrot.slane %v512_v29, %v506_v20 }
  0x30   :  { %374 = vset.pattern.permute.xlu0 %v439_v6 }
  0x31   :  { %341 = vmatpush3.bf16.msra.mxu0 %v377_v8  ;;  %351 = vmatpush3.bf16.msra.mxu1 %v380_v11 }
  0x32   :  { %342 = vmatprep.subr.bf16.mxu0 %v437_v4  ;;  %352 = vmatprep.subr.bf16.mxu1 %v437_v4 }
  0x35   :  { %343 = vmatpush3.bf16.msra.mxu0 %v378_v9  ;;  %353 = vmatpush3.bf16.msra.mxu1 %v381_v39 }
  0x36   :  { %354 = vmatprep.subr.bf16.mxu1 %v437_v4 }
  0x39   :  { %355 = vmatpush3.bf16.msra.mxu1 %v382_v40 }
  0xa6   :  { %v58_v17 = vpop.permute.xlu0 %57  ;;  %v77_v19 = vpop.permute.xlu1 %76 }
  0xa7   :  { %v64_v27 = vmul.f32 %v63_v21, %v58_v17  ;;  %v83_v30 = vmul.f32 %v82_v23, %v77_v19 }
  0xab   :  { %v67_v25 = vpop.permute.xlu0 %66  ;;  %v87_v26 = vpop.permute.xlu1 %86 }
  0xac   :  { %v73_v28 = vmul.f32 %v72_v22, %v67_v25  ;;  %v93_v32 = vmul.f32 %v92_v24, %v87_v26 }
  0xae   :  { %v74_v31 = vadd.f32 %v73_v28, %v64_v27 }
  0xb0   :  { %v84_v34 = vadd.f32 %v83_v30, %v74_v31 }
  0xb2   :  { %v94_v35 = vadd.f32 %v93_v32, %v84_v34 }
  0xb4   :  { %v99_v36 = vadd.f32 %v98_v33, %v94_v35 }
  0xb6   :  { %v100_v37 = vmax.f32 %v99_v36, 0.0 }
  0xb8   :  { %v101_v38 = vpack.c.bf16 %v100_v37, %v100_v37 }
  0xba   :  { %345 = vmatmul.mubr.msk.bf16.vlgmr.msra.gmra.mrb[0].mxu0 %vm138_vm1, %v101_v38 }
 0x18d   :  { %v176_v42 = vpop.f32.mrb[0].mxu0 }
 0x18e   :  { %v177_v43 = vadd.f32 %v176_v42, %v113_v41  ;;  %v346_v44 = vpop.f32.mrb[1].mxu0 }
 0x18f   :  { %v179_v45 = vpop.f32.mrb[2].mxu0 }
 0x190   :  { %v182_v46 = vmax.f32 %v177_v43, 0.0  ;;  %v347_v47 = vpop.f32.mrb[3].mxu0 }
 0x192   :  { %v183_v48 = vpack.c.bf16 %v182_v46, %v182_v46 }
 0x194   :  { %357 = vmatmul.mubr.msk.bf16.vlgmr.msra.gmra.mrb[0].mxu1 %vm138_vm1, %v183_v48 }
 0x267   :  { %v257_v51 = vpop.f32.mrb[0].mxu1 }
 0x268   :  { %v258_v52 = vadd.f32 %v257_v51, %v195_v49  ;;  %v358_v53 = vpop.f32.mrb[1].mxu1 }
 0x269   :  { %v260_v56 = vpop.f32.mrb[2].mxu1 }
 0x26a   :  { %v263_v57 = vmax.f32 %v258_v52, 0.0  ;;  %v359_v58 = vpop.f32.mrb[3].mxu1 }
 0x26c   :  { %v277_v61 = vmul.f32 %v276_v54, %v263_v57  ;;  %v269_v62 = vmul.f32 %v268_v55, %v263_v57  ;;  %v285_v1 = vmul.f32 %v284_v59, %v263_v57  ;;  %v293_v2 = vmul.f32 %v292_v60, %v263_v57 }
 0x26e   :  { %v278_v63 = vsel %vm138_vm1, %v277_v61, 0.0  ;;  %v270_v0 = vsel %vm138_vm1, %v269_v62, 0.0  ;;  %v286_v3 = vsel %vm138_vm1, %v285_v1, 0.0  ;;  %v294_v4 = vsel %vm138_vm1, %v293_v2, 0.0 }
 0x26f   :  { %279 = vadd.xlane.f32.xlu0 %v278_v63  ;;  %271 = vadd.xlane.f32.xlu1 %v270_v0 }
 0x273   :  { %287 = vadd.xlane.f32.xlu0 %v286_v3  ;;  %295 = vadd.xlane.f32.xlu1 %v294_v4 }
 0x2fc   :  { %v280_v5 = vpop.xlane.xlu0 %279  ;;  %v272_v6 = vpop.xlane.xlu1 %271 }
 0x2fd   :  { %v298_v8 = vsel %vm297_vm2, %v272_v6, %v280_v5 }
 0x300   :  { %v288_v9 = vpop.xlane.xlu0 %287  ;;  %v296_v10 = vpop.xlane.xlu1 %295 }
 0x301   :  { %v300_v11 = vsel %vm299_vm3, %v298_v8, %v288_v9 }
 0x302   :  { %v302_v12 = vsel %vm301_vm4, %v300_v11, %v296_v10 }
 0x303   :  { %v307_v13 = vadd.f32 %v306_v7, %v302_v12 }
 0x305   :  { %309 = vst.msk [vmem:[%s538_s6] sm:$0xff] %vm308_vm5, %v307_v13 }
 0x306   :  { %314 = vsyncpa [#allocation3], 1 }
 0x307   :  { %315 = vsyncpa [#allocation5], 1 }

</bundles_post_ra>
